<compile_context>
chip_gen: v7x
topology: tpu7x:2x2x1
jax: 0.10.0
libtpu: 0.0.40
codegen_flags: <defaults>
</compile_context>

<pallas_src>
import functools

import jax
import jax.numpy as jnp
from jax import lax
from jax.experimental import pallas as pl
from jax.experimental.pallas import tpu as pltpu


def _netvlad_kernel(x_ref, w_ref, b_ref, cent_ref, out_ref, acc_ref, asum_ref,
                    *, s_total, t_s, n_s_local, mask_tail):
    # x_ref:    (1, C, tS)   one S-tile of one sample (channels on sublanes, space on lanes)
    # w_ref:    (K, C) bf16  1x1-conv weight
    # b_ref:    (K, 1) f32   conv bias (column vector -> broadcasts over S)
    # cent_ref: (K, C) f32   cluster centroids
    # out_ref:  (1, 1, K, C) partial VLAD descriptor for this (split, sample)
    # acc_ref:  (K, C) f32   VMEM accumulator for sum_s a[k,s] * xn[c,s]
    # asum_ref: (K, 1) f32   VMEM accumulator for sum_s a[k,s]
    p = pl.program_id(0)       # S-split index (fills the 2nd TensorCore when N < 2)
    s = pl.program_id(2)       # S-tile index within this split

    @pl.when(s == 0)
    def _():
        acc_ref[...] = jnp.zeros_like(acc_ref)
        asum_ref[...] = jnp.zeros_like(asum_ref)

    # --- descriptor-wise L2 normalization along channels (sublane reduce), f32 ---
    xf = x_ref[0].astype(jnp.float32)                       # (C, tS)
    sq = jnp.sum(xf * xf, axis=0, keepdims=True)            # (1, tS)
    # x / max(||x||, 1e-12)  ==  x * rsqrt(max(||x||^2, 1e-24))
    inv = lax.rsqrt(jnp.maximum(sq, 1e-24))
    xn = (xf * inv).astype(jnp.bfloat16)                    # (C, tS) bf16 MXU operand

    # --- 1x1 conv -> soft-assignment logits, softmax over clusters (axis 0) ---
    logits = jnp.dot(w_ref[...], xn,
                     preferred_element_type=jnp.float32) + b_ref[...]   # (K, tS) f32
    m = jnp.max(logits, axis=0, keepdims=True)
    e = jnp.exp(logits - m)
    denom = jnp.sum(e, axis=0, keepdims=True)               # (1, tS)
    a = e * pl.reciprocal(denom, approx=True)               # (K, tS), softmax over K

    if mask_tail:
        # Zero the soft-assignments of zero-padded spatial columns so they do not
        # contribute to asum (their xn columns are already exactly zero).
        base = (p * n_s_local + s) * t_s
        col = lax.broadcasted_iota(jnp.int32, (1, t_s), 1) + base
        a = jnp.where(col < s_total, a, 0.0)

    # --- VLAD aggregation for this S-tile (no transposes: contract last dims) ---
    # akx[k,c] = sum_s a[k,s] * xn[c,s]
    ab = a.astype(jnp.bfloat16)
    akx = lax.dot_general(ab, xn,
                          dimension_numbers=(((1,), (1,)), ((), ())),
                          preferred_element_type=jnp.float32)           # (K, C)
    acc_ref[...] += akx
    asum_ref[...] += jnp.sum(a, axis=1, keepdims=True)      # (K, 1) lane reduce

    @pl.when(s == pl.num_programs(2) - 1)
    def _():
        # Centroid term applied once per (split, sample): vlad = akx_sum - cent * asum
        out_ref[0, 0] = (acc_ref[...]
                         - cent_ref[...] * asum_ref[...]).astype(out_ref.dtype)


def _choose_s_tile(S, C, K, x_itemsize, budget_bytes):
    """Largest S tile whose *live* VMEM footprint fits `budget_bytes`.

    Per-column (per spatial position) live bytes, approx:
      x stream, double-buffered          : 2 * C * x_itemsize
      x_f32 + xn_bf16 intermediates      : 4*C + 2*C
      logits / e / a (f32) + a (bf16)    : 3*4*K + 2*K
    plus small fixed (K,C) buffers (accumulator, centroids, output block).

    Returns (t_s, s_pad): s_pad >= S is a multiple of t_s (== S when no padding
    is needed).  Tiles other than the full extent are multiples of 128 (lane axis).
    """
    col_bytes = 2 * C * x_itemsize + 6 * C + 14 * K
    fixed = 6 * K * C * 4
    avail = max(budget_bytes - fixed, 128 * col_bytes)
    max_ts = avail // col_bytes
    if S <= max_ts:
        return S, S
    max_ts = max((max_ts // 128) * 128, 128)
    # Prefer an exact divisor of S (no padding), but never shrink below half the
    # budget-fitting tile (keeps the pipeline in the fast, large-tile regime).
    floor = max(128, (max_ts // 2 // 128) * 128)
    ts = max_ts
    while ts >= floor:
        if S % ts == 0:
            return ts, S
        ts -= 128
    s_pad = -(-S // max_ts) * max_ts
    return max_ts, s_pad


def netvlad_forward(x_nchw, conv_w, conv_b, centroids,
                    vmem_budget_bytes=24 * 1024 * 1024):
    """x_nchw: (N, C, H, W); conv_w: (K, C) or (K, C, 1, 1); conv_b: (K,); centroids: (K, C).

    `vmem_budget_bytes` bounds the live VMEM footprint of the kernel.  The 24 MiB
    default is generation-safe (fits v7x's 32 MiB scoped default); on v5e/v6e
    (128 MiB physical) it can be raised for larger S tiles.  x may be bf16 to halve
    HBM traffic on bandwidth-limited parts — the kernel upcasts in VMEM.
    """
    N, C, H, W = x_nchw.shape
    K = centroids.shape[0]
    S = H * W

    # Free reshape (no transpose, no dtype copy): NCHW -> (N, C, S).
    x_ncs = x_nchw.reshape(N, C, S)
    w = conv_w.reshape(K, C).astype(jnp.bfloat16)     # MXU operand dtype
    b = conv_b.reshape(K, 1).astype(jnp.float32)
    cent = centroids.astype(jnp.float32)

    t_s, s_pad = _choose_s_tile(S, C, K, x_ncs.dtype.itemsize, vmem_budget_bytes)

    # Fill both v7x TensorCores when the batch axis alone cannot: split the S
    # reduction into n_split partial accumulations (leading "parallel" grid axis)
    # and sum the tiny (K,C) partials in the wrapper.  No-op on v5e/v6e (1 TC).
    n_split = 2 if (N < 2 and s_pad // t_s >= 2) else 1
    s_pad = -(-s_pad // (t_s * n_split)) * (t_s * n_split)
    n_s_local = s_pad // (t_s * n_split)
    mask_tail = s_pad != S

    if s_pad != S:
        x_ncs = jnp.pad(x_ncs, ((0, 0), (0, 0), (0, s_pad - S)))

    kernel = functools.partial(_netvlad_kernel, s_total=S, t_s=t_s,
                               n_s_local=n_s_local, mask_tail=mask_tail)

    partials = pl.pallas_call(
        kernel,
        out_shape=jax.ShapeDtypeStruct((n_split, N, K, C), jnp.float32),
        grid_spec=pltpu.PrefetchScalarGridSpec(
            num_scalar_prefetch=0,
            grid=(n_split, N, n_s_local),
            in_specs=[
                pl.BlockSpec((1, C, t_s), lambda p, n, s: (n, 0, p * n_s_local + s)),
                pl.BlockSpec((K, C), lambda p, n, s: (0, 0)),
                pl.BlockSpec((K, 1), lambda p, n, s: (0, 0)),
                pl.BlockSpec((K, C), lambda p, n, s: (0, 0)),
            ],
            out_specs=pl.BlockSpec((1, 1, K, C), lambda p, n, s: (p, n, 0, 0)),
            scratch_shapes=[pltpu.VMEM((K, C), jnp.float32),
                            pltpu.VMEM((K, 1), jnp.float32)],
        ),
        compiler_params=pltpu.CompilerParams(
            dimension_semantics=("parallel", "parallel", "arbitrary"),
            vmem_limit_bytes=max(32 * 1024 * 1024,
                                 vmem_budget_bytes + 8 * 1024 * 1024)),
    )(x_ncs, w, b, cent)

    if n_split == 1:
        return partials[0]                 # (N, K, C)
    return partials.sum(axis=0)            # combine per-core partial reductions


def _reference(x_nchw, conv_w, conv_b, centroids):
    # pure-JAX f32 reference mirroring the PyTorch code
    N, C, H, W = x_nchw.shape
    K = centroids.shape[0]
    w = conv_w.reshape(K, C)
    norm = jnp.sqrt(jnp.sum(x_nchw * x_nchw, axis=1, keepdims=True))
    xn = x_nchw / jnp.maximum(norm, 1e-12)
    logits = jnp.einsum('nchw,kc->nkhw', xn, w) + conv_b[None, :, None, None]
    soft = jax.nn.softmax(logits.reshape(N, K, -1), axis=1)           # (N, K, S)
    x_flat = xn.reshape(N, C, -1)                                      # (N, C, S)
    resid = x_flat[:, None, :, :] - centroids[None, :, :, None]        # (N, K, C, S)
    resid = resid * soft[:, :, None, :]
    return resid.sum(axis=-1)                                          # (N, K, C)


if __name__ == "__main__":
    key = jax.random.PRNGKey(0)
    k1, k2, k3 = jax.random.split(key, 3)

    # Small shapes consistent with the module (dim=32, num_clusters=16).
    N, C, H, W = 2, 32, 8, 8
    K = 16

    x = jax.random.normal(k1, (N, C, H, W), dtype=jnp.float32)
    # Deterministic synthetic parameters mirroring __init__:
    #   conv weight (K, C) kaiming_normal fan_out -> std = sqrt(2/K); bias zeros;
    #   centroids ~ uniform[0, 1).
    conv_w = jax.random.normal(k2, (K, C), dtype=jnp.float32) * jnp.sqrt(2.0 / K)
    conv_b = jnp.zeros((K,), dtype=jnp.float32)
    centroids = jax.random.uniform(k3, (K, C), dtype=jnp.float32)

    # Test 1: batch-parallel path (single full-S tile at this size).
    out = jax.block_until_ready(netvlad_forward(x, conv_w, conv_b, centroids))
    ref = _reference(x, conv_w, conv_b, centroids)
    assert out.shape == (N, K, C)
    err = float(jnp.max(jnp.abs(out - ref)))
    # bf16 MXU operands + approx reciprocal -> ~1e-3 level error vs. f32 reference.
    assert jnp.allclose(out, ref, atol=2e-2, rtol=2e-2), err

    # Test 2: batch=1 with an S that is not a multiple of 128 and a tiny VMEM
    # budget, exercising the S-tiling, zero-pad + mask, and 2-way S-split paths.
    N2, H2, W2 = 1, 24, 24          # S = 576
    x2 = jax.random.normal(k1, (N2, C, H2, W2), dtype=jnp.float32)
    out2 = jax.block_until_ready(
        netvlad_forward(x2, conv_w, conv_b, centroids,
                        vmem_budget_bytes=96 * 1024))
    ref2 = _reference(x2, conv_w, conv_b, centroids)
    assert out2.shape == (N2, K, C)
    err2 = float(jnp.max(jnp.abs(out2 - ref2)))
    assert jnp.allclose(out2, ref2, atol=2e-2, rtol=2e-2), err2

    print("KERNEL_OK")
</pallas_src>

<mosaic_0001>
module attributes {stable_mosaic.version = 11 : i64} {
  func.func @_netvlad_kernel(%arg0: i32, %arg1: i32, %arg2: i32, %arg3: memref<1x32x64xf32, #tpu.memory_space<vmem>>, %arg4: memref<16x32xbf16, #tpu.memory_space<vmem>>, %arg5: memref<16x1xf32, #tpu.memory_space<vmem>>, %arg6: memref<16x32xf32, #tpu.memory_space<vmem>>, %arg7: memref<1x1x16x32xf32, #tpu.memory_space<vmem>>, %arg8: memref<16x32xf32, #tpu.memory_space<vmem>>, %arg9: memref<16x1xf32, #tpu.memory_space<vmem>>) attributes {dimension_semantics = [#tpu.dimension_semantics<parallel>, #tpu.dimension_semantics<parallel>, #tpu.dimension_semantics<arbitrary>], iteration_bounds = array<i64: 1, 2, 1>, scalar_prefetch = 0 : i64, scratch_operands = 2 : i64, tpu.core_type = #tpu.core_type<tc>, window_params = [{transform_indices = @transform_0, window_bounds = array<i64: 1, 32, 64>}, {pipeline_mode = #tpu.pipeline_mode<synchronous>, transform_indices = @transform_1, window_bounds = array<i64: 16, 32>}, {pipeline_mode = #tpu.pipeline_mode<synchronous>, transform_indices = @transform_2, window_bounds = array<i64: 16, 1>}, {pipeline_mode = #tpu.pipeline_mode<synchronous>, transform_indices = @transform_3, window_bounds = array<i64: 16, 32>}, {transform_indices = @transform_4, window_bounds = array<i64: 1, 1, 16, 32>}]} {
    %c0_i32 = arith.constant 0 : i32
    %0 = arith.cmpi eq, %arg2, %c0_i32 : i32
    %1 = arith.extui %0 : i1 to i32
    %c0_i32_0 = arith.constant 0 : i32
    %2 = arith.cmpi ne, %1, %c0_i32_0 : i32
    scf.if %2 {
      %cst_23 = arith.constant 0.000000e+00 : f32
      %42 = vector.broadcast %cst_23 : f32 to vector<16x32xf32>
      %c0_24 = arith.constant 0 : index
      %c0_25 = arith.constant 0 : index
      %43 = vector.load %arg8[%c0_24, %c0_25] : memref<16x32xf32, #tpu.memory_space<vmem>>, vector<16x32xf32>
      tpu.vector_store %arg8[%c0_24, %c0_25], %42 {strides = array<i32>} : memref<16x32xf32, #tpu.memory_space<vmem>>, vector<16x32xf32>,
      %cst_26 = arith.constant 0.000000e+00 : f32
      %44 = vector.broadcast %cst_26 : f32 to vector<16x1xf32>
      %c0_27 = arith.constant 0 : index
      %c0_28 = arith.constant 0 : index
      %45 = vector.load %arg9[%c0_27, %c0_28] : memref<16x1xf32, #tpu.memory_space<vmem>>, vector<16x1xf32>
      tpu.vector_store %arg9[%c0_27, %c0_28], %44 {strides = array<i32>} : memref<16x1xf32, #tpu.memory_space<vmem>>, vector<16x1xf32>,
    } else {
    }
    %c0 = arith.constant 0 : index
    %c0_1 = arith.constant 0 : index
    %c0_2 = arith.constant 0 : index
    %3 = vector.load %arg3[%c0, %c0_1, %c0_2] : memref<1x32x64xf32, #tpu.memory_space<vmem>>, vector<1x32x64xf32>
    %4 = vector.shape_cast %3 : vector<1x32x64xf32> to vector<32x64xf32>
    %5 = arith.mulf %4, %4 : vector<32x64xf32>
    %cst = arith.constant dense<0.000000e+00> : vector<64xf32>
    %6 = vector.multi_reduction <add>, %5, %cst [0] : vector<32x64xf32> to vector<64xf32>
    %7 = vector.shape_cast %6 : vector<64xf32> to vector<1x64xf32>
    %cst_3 = arith.constant 1.000000e-24 : f32
    %8 = vector.broadcast %cst_3 : f32 to vector<1x64xf32>
    %9 = arith.maximumf %7, %8 : vector<1x64xf32>
    %10 = math.rsqrt %9 : vector<1x64xf32>
    %11 = vector.broadcast %10 : vector<1x64xf32> to vector<32x64xf32>
    %12 = arith.mulf %4, %11 : vector<32x64xf32>
    %13 = arith.truncf %12 : vector<32x64xf32> to vector<32x64xbf16>
    %c0_4 = arith.constant 0 : index
    %c0_5 = arith.constant 0 : index
    %14 = vector.load %arg4[%c0_4, %c0_5] : memref<16x32xbf16, #tpu.memory_space<vmem>>, vector<16x32xbf16>
    %cst_6 = arith.constant dense<0.000000e+00> : vector<16x64xf32>
    %15 = tpu.matmul %14, %13, %cst_6 {dimension_numbers = #tpu.dot_dimension_numbers<[1], [0], [0], [1], [0, 0, 1, 1], [], []>} : vector<16x32xbf16>, vector<32x64xbf16>, vector<16x64xf32> -> vector<16x64xf32>
    %c0_7 = arith.constant 0 : index
    %c0_8 = arith.constant 0 : index
    %16 = vector.load %arg5[%c0_7, %c0_8] : memref<16x1xf32, #tpu.memory_space<vmem>>, vector<16x1xf32>
    %17 = vector.broadcast %16 : vector<16x1xf32> to vector<16x64xf32>
    %18 = arith.addf %15, %17 : vector<16x64xf32>
    %cst_9 = arith.constant dense<0xFF800000> : vector<64xf32>
    %19 = vector.multi_reduction <maximumf>, %18, %cst_9 [0] : vector<16x64xf32> to vector<64xf32>
    %20 = vector.shape_cast %19 : vector<64xf32> to vector<1x64xf32>
    %21 = vector.broadcast %20 : vector<1x64xf32> to vector<16x64xf32>
    %22 = arith.subf %18, %21 : vector<16x64xf32>
    %23 = math.exp %22 : vector<16x64xf32>
    %cst_10 = arith.constant dense<0.000000e+00> : vector<64xf32>
    %24 = vector.multi_reduction <add>, %23, %cst_10 [0] : vector<16x64xf32> to vector<64xf32>
    %25 = vector.shape_cast %24 : vector<64xf32> to vector<1x64xf32>
    %26 = tpu.reciprocal %25 {approx = true} : vector<1x64xf32> -> vector<1x64xf32>
    %27 = vector.broadcast %26 : vector<1x64xf32> to vector<16x64xf32>
    %28 = arith.mulf %23, %27 : vector<16x64xf32>
    %29 = arith.truncf %28 : vector<16x64xf32> to vector<16x64xbf16>
    %cst_11 = arith.constant dense<0.000000e+00> : vector<16x32xf32>
    %30 = tpu.matmul %29, %13, %cst_11 {dimension_numbers = #tpu.dot_dimension_numbers<[1], [1], [0], [0], [0, 0, 1, 0], [], []>} : vector<16x64xbf16>, vector<32x64xbf16>, vector<16x32xf32> -> vector<16x32xf32>
    %c0_12 = arith.constant 0 : index
    %c0_13 = arith.constant 0 : index
    %31 = vector.load %arg8[%c0_12, %c0_13] : memref<16x32xf32, #tpu.memory_space<vmem>>, vector<16x32xf32>
    %32 = arith.addf %31, %30 : vector<16x32xf32>
    %c0_14 = arith.constant 0 : index
    %c0_15 = arith.constant 0 : index
    %33 = vector.load %arg8[%c0_14, %c0_15] : memref<16x32xf32, #tpu.memory_space<vmem>>, vector<16x32xf32>
    tpu.vector_store %arg8[%c0_14, %c0_15], %32 {strides = array<i32>} : memref<16x32xf32, #tpu.memory_space<vmem>>, vector<16x32xf32>,
    %c0_16 = arith.constant 0 : index
    %c0_17 = arith.constant 0 : index
    %34 = vector.load %arg9[%c0_16, %c0_17] : memref<16x1xf32, #tpu.memory_space<vmem>>, vector<16x1xf32>
    %cst_18 = arith.constant dense<0.000000e+00> : vector<16xf32>
    %35 = vector.multi_reduction <add>, %28, %cst_18 [1] : vector<16x64xf32> to vector<16xf32>
    %36 = vector.shape_cast %35 : vector<16xf32> to vector<16x1xf32>
    %37 = arith.addf %34, %36 : vector<16x1xf32>
    %c0_19 = arith.constant 0 : index
    %c0_20 = arith.constant 0 : index
    %38 = vector.load %arg9[%c0_19, %c0_20] : memref<16x1xf32, #tpu.memory_space<vmem>>, vector<16x1xf32>
    tpu.vector_store %arg9[%c0_19, %c0_20], %37 {strides = array<i32>} : memref<16x1xf32, #tpu.memory_space<vmem>>, vector<16x1xf32>,
    %c0_i32_21 = arith.constant 0 : i32
    %39 = arith.cmpi eq, %arg2, %c0_i32_21 : i32
    %40 = arith.extui %39 : i1 to i32
    %c0_i32_22 = arith.constant 0 : i32
    %41 = arith.cmpi ne, %40, %c0_i32_22 : i32
    scf.if %41 {
      %c0_23 = arith.constant 0 : index
      %c0_24 = arith.constant 0 : index
      %42 = vector.load %arg8[%c0_23, %c0_24] : memref<16x32xf32, #tpu.memory_space<vmem>>, vector<16x32xf32>
      %c0_25 = arith.constant 0 : index
      %c0_26 = arith.constant 0 : index
      %43 = vector.load %arg6[%c0_25, %c0_26] : memref<16x32xf32, #tpu.memory_space<vmem>>, vector<16x32xf32>
      %c0_27 = arith.constant 0 : index
      %c0_28 = arith.constant 0 : index
      %44 = vector.load %arg9[%c0_27, %c0_28] : memref<16x1xf32, #tpu.memory_space<vmem>>, vector<16x1xf32>
      %45 = vector.broadcast %44 : vector<16x1xf32> to vector<16x32xf32>
      %46 = arith.mulf %43, %45 : vector<16x32xf32>
      %47 = arith.subf %42, %46 : vector<16x32xf32>
      %c0_29 = arith.constant 0 : index
      %c0_30 = arith.constant 0 : index
      %c0_31 = arith.constant 0 : index
      %c0_32 = arith.constant 0 : index
      %48 = vector.load %arg7[%c0_29, %c0_30, %c0_31, %c0_32] : memref<1x1x16x32xf32, #tpu.memory_space<vmem>>, vector<1x1x16x32xf32>
      %49 = vector.shape_cast %48 : vector<1x1x16x32xf32> to vector<16x32xf32>
      %50 = vector.shape_cast %47 : vector<16x32xf32> to vector<1x1x16x32xf32>
      tpu.vector_store %arg7[%c0_29, %c0_30, %c0_31, %c0_32], %50 {strides = array<i32>} : memref<1x1x16x32xf32, #tpu.memory_space<vmem>>, vector<1x1x16x32xf32>,
    } else {
    }
    return
  }
  func.func @transform_0(%arg0: i32, %arg1: i32, %arg2: i32) -> (i32, i32, i32) {
    %c1_i32 = arith.constant 1 : i32
    %0 = arith.muli %arg0, %c1_i32 : i32
    %1 = arith.addi %0, %arg2 : i32
    %c0_i32 = arith.constant 0 : i32
    %c0_i32_0 = arith.constant 0 : i32
    return %arg1, %c0_i32, %1 : i32, i32, i32
  }
  func.func @transform_1(%arg0: i32, %arg1: i32, %arg2: i32) -> (i32, i32) {
    %c0_i32 = arith.constant 0 : i32
    %c0_i32_0 = arith.constant 0 : i32
    %c0_i32_1 = arith.constant 0 : i32
    return %c0_i32, %c0_i32_0 : i32, i32
  }
  func.func @transform_2(%arg0: i32, %arg1: i32, %arg2: i32) -> (i32, i32) {
    %c0_i32 = arith.constant 0 : i32
    %c0_i32_0 = arith.constant 0 : i32
    %c0_i32_1 = arith.constant 0 : i32
    return %c0_i32, %c0_i32_0 : i32, i32
  }
  func.func @transform_3(%arg0: i32, %arg1: i32, %arg2: i32) -> (i32, i32) {
    %c0_i32 = arith.constant 0 : i32
    %c0_i32_0 = arith.constant 0 : i32
    %c0_i32_1 = arith.constant 0 : i32
    return %c0_i32, %c0_i32_0 : i32, i32
  }
  func.func @transform_4(%arg0: i32, %arg1: i32, %arg2: i32) -> (i32, i32, i32, i32) {
    %c0_i32 = arith.constant 0 : i32
    %c0_i32_0 = arith.constant 0 : i32
    %c0_i32_1 = arith.constant 0 : i32
    return %arg0, %arg1, %c0_i32, %c0_i32_0 : i32, i32, i32, i32
  }
}

</mosaic_0001>

<bundles_post_ra>
// kernel: tpu_custom_call.1
= control target key start
LH: loop header
LB: loop body
LE: loop exit
PB: predicated region body
PF: predicated region fallthrough
CT: control target
= control target key end

     0   :  { %9 = vsyncpa [#allocation5], 0  ;;  %s1062_s0 = inlined_call_operand.hbm [shape: f32[2,32,64], index: 0, kind: input, shape index: {}]   ;;  %s1063_s1 = inlined_call_operand.vmem [shape: bf16[16,32], index: 1, kind: input, shape index: {}]   ;;  %s1064_s2 = inlined_call_operand.vmem [shape: f32[16,1], index: 2, kind: input, shape index: {}]   ;;  %s1065_s3 = inlined_call_operand.vmem [shape: f32[16,32], index: 3, kind: input, shape index: {}]   ;;  %s1066_s4 = inlined_call_operand.hbm [shape: f32[1,2,16,32], index: 4, kind: output, shape index: {}]  }
   0x1   :  { %11 = vsyncpa [#allocation5 + $0x1], 0 }
   0x2   :  { %12 = vsyncpa [#allocation6], 0 }
   0x3   :  { %14 = vsyncpa [#allocation6 + $0x1], 0  ;;  %s847_s15 = smov 0   ;;  %s849_s16 = smov 0  }
   0x4   :  { %s851_s17 = smov 0   ;;  %s853_s18 = smov 0  }
   0x5   :  { %s855_s19 = smov 0   ;;  %s857_s20 = smov 0  }
   0x6 LB: > { %s577_s21 = sadd.s32 4294967295, %s811_s20   ;;  %s578_s22 = sadd.s32 4294967294, %s811_s20   ;;  %s811_s20 = sphi %s857_s20, %s20_s20   ;;  %s807_s19 = sphi %s855_s19, %s1081_s19   ;;  %s803_s18 = sphi %s853_s18, %s1080_s18   ;;  %s799_s17 = sphi %s851_s17, %s1079_s17   ;;  %s795_s16 = sphi %s849_s16, %s1078_s16   ;;  %s791_s15 = sphi %s847_s15, %s1077_s15  }
   0x7   : > { %s35_s23 = sadd.s32 1, %s807_s19  ;;  %s50_s24 = sadd.s32 1, %s799_s17 }
   0x8   : > { %p37_p0 = scmp.ge.s32.totalorder %s35_s23, 2  ;;  %p57_p1 = scmp.ne.s32.totalorder %s799_s17, %s795_s16 }
   0x9   : > { %p58_p2 = scmp.eq.s32.totalorder %s811_s20, 0  ;;  %p63_p3 = scmp.ne.s32.totalorder %s795_s16, %s791_s15 }
   0xa   : > { %s1083_s23 = smov (%p37_p0, %s35_s23), 0  ;;  %p64_p5 = scmp.eq.s32.totalorder %s577_s21, 0 }
   0xb   : > { %p888_p4 = por %p58_p2, %p57_p1  ;;  %s45_s26 = ssub.s32 %s807_s19, %s1083_s23 }
   0xc   : > { %p152_p6 = scmp.eq.s32.totalorder %s577_s21, 1  ;;  %p48_p7 = scmp.eq.s32.totalorder %s45_s26, 0 }
   0xd   : > { %p894_p8 = por %p64_p5, %p63_p3  ;;  %p158_p10 = scmp.eq.s32.totalorder %s578_s22, 1 }
   0xe   : > { %p898_p9 = por %p152_p6, %p57_p1  ;;  %p631_p13 = scmp.lt.s32.totalorder %s811_s20, 2 }
   0xf   : > { %s903_s29 = scalar_select %p48_p7, %s799_s17, %s50_s24  }
  0x10   : > { %s1070_s28 = scalar_select %p898_p9, 1, 0 }
  0x11   : > { %p905_p11 = por %p158_p10, %p63_p3  ;;  %s187_s5 = sand.u32 1, %s799_s17  }
  0x12   : > { %s581_s6 = sshll.u32 %s187_s5, 5  ;;  %s595_s7 = sshll.u32 %s807_s19, 9 }
  0x13   : > { %s1071_s30 = scalar_select %p905_p11, 1, 0 }
  0x14   : > { %s916_s10 = scalar_lea.hbm %s1062_s0, %s595_s7  ;;  %s191_s11 = scalar_lea.vmem [#allocation4], %s581_s6 }
  0x15   : > { %s200_s12 = sshll.u32 %s191_s11, 4  ;;  %p922_p0 = pnand %p631_p13, %p888_p4  ;;  %s918_s12 = int_to_ptr.vmem [resolvable:$true] %s200_s12 }
  0x16   : > { %s927_s14 = scalar_lea.sflag [#allocation5], %s187_s5  ;;  %s699_s21 = scalar_lea.hbm %s916_s10, 512 }
  0x17   : > { %p700_p2 = scmp.ne.s32.totalorder %s916_s10, %s699_s21  ;;  %p701_p3 = pneg %p922_p0 }
  0x18   : > { %s704_s25 = scalar_lea.hbm %s1062_s0, 1024  ;;  %p705_p4 = scmp.lt.u32.totalorder %s916_s10, %s1062_s0 }
  0x19   : > { %p702_p5 = pnand %p701_p3, %p700_p2  ;;  %p706_p7 = scmp.lt.u32.totalorder %s704_s25, %s699_s21 }
  0x1a   : > { %p708_p13 = scmp.lt.u32.totalorder %s699_s21, %s916_s10 }
  0x1b   : > { %p703_p6 = pneg %p702_p5  ;;  %p707_p10 = por %p706_p7, %p705_p4 }
  0x1d   : > { %p709_p12 = por %p708_p13, %p707_p10 }
  0x1f   : > { %p710_p1 = pnand %p709_p12, %p703_p6 }
  0x21   : > { %713 = shalt.err (!%p710_p1)
}
  0x22   : > { %s714_s5 = scalar_lea.vmem %s918_s12, 512  ;;  %s813_s7 = smov [#allocation4]  }
  0x23   : > { %p715_p2 = scmp.ne.s32.totalorder %s918_s12, %s714_s5  ;;  %s719_s8 = sshll.u32 %s813_s7, 4  ;;  %s720_s8 = int_to_ptr.vmem [resolvable:$false] %s719_s8 }
  0x24   : > { %s721_s9 = scalar_lea.vmem %s720_s8, 1024  ;;  %p722_p9 = scmp.lt.s32.totalorder %s918_s12, %s720_s8 }
  0x25   : > { %p717_p5 = pnand %p715_p2, %p701_p3  ;;  %p723_p4 = scmp.lt.s32.totalorder %s721_s9, %s714_s5 }
  0x27   : > { %p718_p11 = pneg %p717_p5  ;;  %p724_p7 = por %p723_p4, %p722_p9 }
  0x29   : > { %p725_p10 = pnand %p724_p7, %p718_p11 }
  0x2b   : > { %728 = shalt.err (!%p725_p10)
}
  0x2c   : > { %s814_s11 = smov 128   ;;  %s815_s21 = smov 8  }
  0x2d   : > { %626 = dma.hbm_to_vmem [thread:$0]  (!%p922_p0), %s916_s10, 512, %s918_s12, %s927_s14, %s814_s11, %s814_s11, %s815_s21  }
  0x2e   : > { %p208_p12 = scmp.lt.s32.totalorder %s811_s20, 3  ;;  %p1073_p1 = scmp.ge.s32.totalorder %s811_s20, 1 }
  0x30   : > { %p209_p3 = pnand %p1073_p1, %p208_p12 }
  0x31   : > { %s959_s22 = sand.u32 (!%p209_p3), 1, %s795_s16  }
  0x32   : > { %212 = sbr.rel (%p209_p3) target bundleno = 684 (0x2ac), region = 36  ;;  %s585_s24 = sshll.u32 (!%p209_p3), %s959_s22, 5 }
  0x33   : > { %s215_s25 = scalar_lea.sflag (!%p209_p3), [#allocation5], %s959_s22  ;;  %s218_s26 = scalar_lea.vmem (!%p209_p3), [#allocation4], %s585_s24 }
  0x39   : > { %782 = dma.done.wait (%p894_p8), %s215_s25, 512  }
  0x3a   : > { %784 = vsyncadd (%p894_p8), %s215_s25, 4294966784  ;;  %vm249_vm0 = vcmask 261120   ;;  %v816_v0 = vmov 0.0   ;;  %vm817_vm1 = vmmov 0   ;;  %v818_v1 = vmov 0   ;;  %v255_v2 = vld [vmem:[%s218_s26] sm:$0xff] }
  0x3b   : > { %603 = vmatprep.subr.bf16.mxu0 %v816_v0  ;;  %607 = vmatprep.mubr.msk.bf16.mxu0 %vm817_vm1, %v816_v0  ;;  %250 = vst.msk [vmem:[#allocation2] sm:$0xff] %vm249_vm0, %v816_v0  ;;  %251 = vst.msk [vmem:[#allocation2 + $0x8] sm:$0xff] %vm249_vm0, %v816_v0  ;;  %v256_v3 = vld [vmem:[%s218_s26 + $0x8] sm:$0xff]  ;;  %v257_v4 = vld [vmem:[%s218_s26 + $0x10] sm:$0xff]  ;;  %vm263_vm2 = vcmask 523264   ;;  %v259_v6 = vmul.f32 %v255_v2, %v255_v2  ;;  %vm252_vm3 = vcmask 7168  }
  0x3c   : > { %688 = vset.pattern.permute.xlu0 %v818_v1  ;;  %611 = vmatprep.subr.bf16.mxu1 %v816_v0  ;;  %v258_v5 = vld [vmem:[%s218_s26 + $0x18] sm:$0xff]  ;;  %v260_v7 = vmul.f32 %v256_v3, %v256_v3  ;;  %v261_v8 = vmul.f32 %v257_v4, %v257_v4  ;;  %v287_v10 = vld [vmem:[%s1064_s2] sm:$0xff]  ;;  %v288_v15 = vld [vmem:[%s1064_s2 + $0x8] sm:$0xff]  ;;  %253 = vst.msk [vmem:[#allocation3] sm:$0xff] %vm252_vm3, %v816_v0  ;;  %s586_s8 = sshll.u32 %s959_s22, 4  ;;  %s596_s21 = sshll.u32 %s803_s18, 8 }
  0x3d   : > { %615 = vmatprep.mubr.msk.bf16.mxu1 %vm817_vm1, %v816_v0  ;;  %689 = vset.pattern.permute.xlu1 %v818_v1  ;;  %v262_v9 = vmul.f32 %v258_v5, %v258_v5  ;;  %v264_v11 = vsel %vm263_vm2, %v259_v6, 0.0  ;;  %v690_v33 = vld [vmem:[%s1063_s1] sm:$0xff]   ;;  %254 = vst.msk [vmem:[#allocation3 + $0x8] sm:$0xff] %vm252_vm3, %v816_v0  ;;  %s242_s24 = scalar_lea.vmem [#allocation7], %s586_s8  ;;  %s1010_s10 = scalar_lea.hbm %s1066_s4, %s596_s21 }
  0x3e   : > { %v265_v12 = vsel %vm263_vm2, %v260_v7, 0.0  ;;  %v267_v13 = vsel %vm263_vm2, %v261_v8, 0.0  ;;  %291 = vperm.xlu0 %688, %v287_v10   ;;  %s487_s25 = sshll.u32 %s242_s24, 4  ;;  %s472_s18 = scalar_lea.sflag [#allocation6], %s959_s22  ;;  %s1012_s25 = int_to_ptr.vmem [resolvable:$true] %s487_s25 }
  0x3f   : > { %v266_v14 = vadd.f32 %v265_v12, %v264_v11  ;;  %v269_v16 = vsel %vm263_vm2, %v262_v9, 0.0  ;;  %s729_s12 = scalar_lea.vmem %s1012_s25, 256  ;;  %p1074_p9 = scmp.ne.s32.totalorder %s1070_s28, 0 }
  0x40   : > { %p730_p8 = scmp.ne.s32.totalorder %s1012_s25, %s729_s12  ;;  %s819_s13 = smov [#allocation7]  }
  0x41   : > { %v268_v17 = vadd.f32 %v267_v13, %v266_v14  ;;  %s733_s14 = sshll.u32 %s819_s13, 4  ;;  %s734_s14 = int_to_ptr.vmem [resolvable:$false] %s733_s14 }
  0x42   : > { %296 = vperm.xlu0 %688, %v288_v15   ;;  %p731_p11 = pnand %p730_p8, %p1074_p9  ;;  %s735_s6 = scalar_lea.vmem %s734_s14, 512 }
  0x43   : > { %v270_v18 = vadd.f32 %v269_v16, %v268_v17  ;;  %v433_v10 = vld [vmem:[#allocation3] sm:$0xff]  ;;  %p736_p6 = scmp.lt.s32.totalorder %s1012_s25, %s734_s14  ;;  %p737_p13 = scmp.lt.s32.totalorder %s735_s6, %s729_s12 }
  0x44   : > { %v434_v13 = vld [vmem:[#allocation3 + $0x8] sm:$0xff]  ;;  %p732_p0 = pneg %p731_p11 }
  0x45   : > { %v271_v19 = vrot.slane %v270_v18, 4  ;;  %p738_p2 = por %p737_p13, %p736_p6 }
  0x47   : > { %v272_v20 = vadd.f32 %v271_v19, %v270_v18  ;;  %v427_v18 = vld [vmem:[#allocation2] sm:$0xff]  ;;  %p739_p5 = pnand %p738_p2, %p732_p0 }
  0x49   : > { %v273_v21 = vrot.slane %v272_v20, 2 }
  0x4b   : > { %v274_v22 = vadd.f32 %v273_v21, %v272_v20  ;;  %v428_v20 = vld [vmem:[#allocation2 + $0x8] sm:$0xff] }
  0x4d   : > { %v275_v23 = vrot.slane %v274_v22, 1 }
  0x4f   : > { %v276_v24 = vadd.f32 %v275_v23, %v274_v22 }
  0x51   : > { %v277_v25 = vmax.f32 %v276_v24, 1e-24 }
  0x53   : > { %691 = vrsqrt.f32 %v277_v25 }
  0x5d   : > { %v692_v26 = vpop.eup %691 }
  0x5e   : > { %v279_v27 = vmul.f32 %v692_v26, %v255_v2  ;;  %v280_v28 = vmul.f32 %v692_v26, %v256_v3  ;;  %v281_v29 = vmul.f32 %v692_v26, %v257_v4  ;;  %v282_v30 = vmul.f32 %v692_v26, %v258_v5  ;;  %v451_v26 = vld [vmem:[%s1065_s3] sm:$0xff] }
  0x60   : > { %v283_v31 = vpack.c.bf16 %v280_v28, %v279_v27  ;;  %v284_v32 = vpack.c.bf16 %v282_v30, %v281_v29  ;;  %v452_v30 = vld [vmem:[%s1065_s3 + $0x8] sm:$0xff] }
  0x62   : > { %604 = vmatpush3.bf16.msra.mxu0 %v283_v31  ;;  %v381_v34 = vsel %vm263_vm2, %v283_v31, 0  ;;  %v384_v35 = vsel %vm263_vm2, %v284_v32, 0 }
  0x63   : > { %605 = vmatprep.subr.bf16.mxu0 %v816_v0  ;;  %612 = vmatpush3.bf16.xpose.msra.mxu1 %v381_v34 }
  0x64   : > { %613 = vmatprep.subr.bf16.mxu1 %v816_v0 }
  0x66   : > { %606 = vmatpush3.bf16.msra.mxu0 %v284_v32 }
  0x69   : > { %608 = vmatmul.mubr.msk.bf16.vlgmr.msra.gmra.mrb[0].mxu0 %vm249_vm0, %v690_v33 }
  0x6b   : > { %614 = vmatpush3.bf16.xpose.msra.mxu1 %v384_v35 }
  0xbd   : > { %v292_v36 = vpop.permute.xlu0 %291 }
  0xc1   : > { %v297_v40 = vpop.permute.xlu0 %296 }
 0x13c   : > { %v342_v37 = vpop.f32.mrb[0].mxu0 }
 0x13d   : > { %v343_v38 = vadd.f32 %v342_v37, %v292_v36  ;;  %v609_v39 = vpop.f32.mrb[1].mxu0 }
 0x13e   : > { %v345_v41 = vpop.f32.mrb[2].mxu0 }
 0x13f   : > { %v346_v42 = vadd.f32 %v345_v41, %v297_v40  ;;  %v610_v43 = vpop.f32.mrb[3].mxu0  ;;  %v349_v44 = vsel %vm263_vm2, %v343_v38, -inf }
 0x141   : > { %v350_v45 = vsel %vm263_vm2, %v346_v42, -inf }
 0x142   : > { %v351_v46 = vmax.f32 %v349_v44, %v350_v45 }
 0x144   : > { %v352_v47 = vrot.slane %v351_v46, 4 }
 0x146   : > { %v353_v48 = vmax.f32 %v351_v46, %v352_v47 }
 0x148   : > { %v354_v49 = vrot.slane %v353_v48, 2 }
 0x14a   : > { %v355_v50 = vmax.f32 %v353_v48, %v354_v49 }
 0x14c   : > { %v356_v51 = vrot.slane %v355_v50, 1 }
 0x14e   : > { %v357_v52 = vmax.f32 %v355_v50, %v356_v51 }
 0x150   : > { %v358_v53 = vsub.f32 %v343_v38, %v357_v52  ;;  %v359_v54 = vsub.f32 %v346_v42, %v357_v52 }
 0x152   : > { %v360_v55 = vmul.f32 1.442695, %v358_v53  ;;  %v362_v56 = vmul.f32 1.442695, %v359_v54 }
 0x154   : > { %693 = vpow2.f32 %v360_v55 }
 0x155   : > { %695 = vpow2.f32 %v362_v56 }
 0x15e   : > { %v694_v57 = vpop.eup %693 }
 0x15f   : > { %v696_v58 = vpop.eup %695  ;;  %v364_v59 = vsel %vm263_vm2, %v694_v57, 0.0 }
 0x160   : > { %v365_v60 = vsel %vm263_vm2, %v696_v58, 0.0 }
 0x161   : > { %v366_v61 = vadd.f32 %v365_v60, %v364_v59 }
 0x163   : > { %v367_v62 = vrot.slane %v366_v61, 4 }
 0x165   : > { %v368_v63 = vadd.f32 %v367_v62, %v366_v61 }
 0x167   : > { %v369_v0 = vrot.slane %v368_v63, 2 }
 0x169   : > { %v370_v1 = vadd.f32 %v369_v0, %v368_v63 }
 0x16b   : > { %v371_v2 = vrot.slane %v370_v1, 1 }
 0x16d   : > { %v372_v3 = vadd.f32 %v371_v2, %v370_v1 }
 0x16f   : > { %697 = vrcp.f32 %v372_v3 }
 0x179   : > { %v698_v4 = vpop.eup %697 }
 0x17a   : > { %v374_v5 = vmul.f32 %v698_v4, %v694_v57  ;;  %v375_v6 = vmul.f32 %v698_v4, %v696_v58 }
 0x17c   : > { %v435_v7 = vsel %vm263_vm2, %v374_v5, 0.0  ;;  %v376_v8 = vpack.c.bf16 %v375_v6, %v374_v5  ;;  %v438_v9 = vsel %vm263_vm2, %v375_v6, 0.0 }
 0x17d   : > { %436 = vadd.xlane.f32.xlu1 %v435_v7 }
 0x17e   : > { %616 = vmatmul.mubr.msk.bf16.vlgmr.msra.gmra.mrb[0].mxu1 %vm263_vm2, %v376_v8 }
 0x181   : > { %439 = vadd.xlane.f32.xlu1 %v438_v9 }
 0x20a   : > { %v437_v11 = vpop.xlane.xlu1 %436 }
 0x20b   : > { %v441_v12 = vadd.f32 %v437_v11, %v433_v10 }
 0x20d   : > { %444 = vst.msk [vmem:[#allocation3] sm:$0xff] %vm252_vm3, %v441_v12 }
 0x20e   : > { %v440_v14 = vpop.xlane.xlu1 %439 }
 0x20f   : > { %v442_v15 = vadd.f32 %v440_v14, %v434_v13 }
 0x211   : > { %445 = vst.msk [vmem:[#allocation3 + $0x8] sm:$0xff] %vm252_vm3, %v442_v15 }
 0x214   : > { %v453_v16 = vld [vmem:[#allocation3] sm:$0xff] }
 0x215   : > { %457 = vperm.xlu0 %688, %v453_v16  }
 0x218   : > { %v454_v17 = vld [vmem:[#allocation3 + $0x8] sm:$0xff] }
 0x219   : > { %462 = vperm.xlu1 %689, %v454_v17  }
 0x251   : > { %v420_v19 = vpop.f32.mrb[0].mxu1 }
 0x252   : > { %v429_v21 = vadd.f32 %v427_v18, %v420_v19  ;;  %v617_v22 = vpop.f32.mrb[1].mxu1 }
 0x253   : > { %v423_v23 = vpop.f32.mrb[2].mxu1 }
 0x254   : > { %431 = vst.msk [vmem:[#allocation2] sm:$0xff] %vm249_vm0, %v429_v21  ;;  %v430_v24 = vadd.f32 %v428_v20, %v423_v23  ;;  %v618_v25 = vpop.f32.mrb[3].mxu1 }
 0x256   : > { %432 = vst.msk [vmem:[#allocation2 + $0x8] sm:$0xff] %vm249_vm0, %v430_v24 }
 0x25b   : > { %v449_v29 = vld [vmem:[#allocation2] sm:$0xff] }
 0x25d   : > { %v450_v34 = vld [vmem:[#allocation2 + $0x8] sm:$0xff] }
 0x294   : > { %v458_v27 = vpop.permute.xlu0 %457 }
 0x295   : > { %v465_v28 = vmul.f32 %v458_v27, %v451_v26 }
 0x297   : > { %v467_v31 = vsub.f32 %v449_v29, %v465_v28 }
 0x298   : > { %v463_v32 = vpop.permute.xlu1 %462 }
 0x299   : > { %469 = vst.msk [vmem:[%s242_s24] sm:$0xff] %vm249_vm0, %v467_v31  ;;  %v466_v33 = vmul.f32 %v463_v32, %v452_v30 }
 0x29b   : > { %v468_v35 = vsub.f32 %v450_v34, %v466_v33 }
 0x29d   : > { %470 = vst.msk [vmem:[%s242_s24 + $0x8] sm:$0xff] %vm249_vm0, %v468_v35 }
 0x29e   : > { %742 = shalt.err (!%p739_p5)
}
 0x29f   : > { %s743_s5 = scalar_lea.hbm %s1010_s10, 256  ;;  %s747_s9 = scalar_lea.hbm %s1066_s4, 512 }
 0x2a0   : > { %p744_p4 = scmp.ne.s32.totalorder %s1010_s10, %s743_s5  ;;  %p748_p12 = scmp.lt.u32.totalorder %s1010_s10, %s1066_s4 }
 0x2a1   : > { %p749_p1 = scmp.lt.u32.totalorder %s747_s9, %s743_s5  ;;  %p751_p8 = scmp.lt.u32.totalorder %s743_s5, %s1010_s10 }
 0x2a2   : > { %p745_p7 = pnand %p744_p4, %p1074_p9 }
 0x2a3   : > { %p750_p3 = por %p749_p1, %p748_p12 }
 0x2a4   : > { %p746_p10 = pneg %p745_p7 }
 0x2a5   : > { %p752_p11 = por %p751_p8, %p750_p3 }
 0x2a7   : > { %p753_p0 = pnand %p752_p11, %p746_p10 }
 0x2a9   : > { %756 = shalt.err (!%p753_p0)
}
 0x2aa   : > { %s820_s24 = smov 128   ;;  %s821_s26 = smov 8  }
 0x2ab   : > { %621 = dma.vmem_to_hbm [thread:$0]  (%p1074_p9), %s1012_s25, 256, %s1010_s10, %s472_s18, %s820_s24, %s820_s24, %s821_s26  }
 0x2ac PF: > { %s502_s27 = sand.u32 1, %s791_s15   ;;  %p1075_p6 = scmp.ne.s32.totalorder %s1071_s30, 0 }
 0x2ad   : > { %p1076_p13 = scmp.ge.s32.totalorder %s811_s20, 2  ;;  %s503_s12 = scalar_lea.sflag [#allocation6], %s502_s27 }
 0x2af   : > { %p628_p2 = pnand %p1076_p13, %p1075_p6 }
 0x2b1   : > { %786 = dma.done.wait (!%p628_p2), %s503_s12, 256  }
 0x2b2   : > { %788 = vsyncadd (!%p628_p2), %s503_s12, 4294967040  ;;  %s20_s20 = sadd.s32 1, %s811_s20   ;;  %s1077_s15 = smov %s795_s16 }
 0x2b3   : > { %p17_p5 = scmp.ge.s32.totalorder %s20_s20, 4   ;;  %s1078_s16 = smov %s799_s17 }
 0x2b4   : > { %s1079_s17 = smov %s903_s29  ;;  %s1080_s18 = smov %s807_s19 }
 0x2b5   : > { %s1081_s19 = smov %s1083_s23  ;;  %19 = sbr.rel (!%p17_p5) target bundleno = 6 (0x6), region = 89 }
 0x2bc   :  { %508 = vsyncpa [#allocation5], 1 }
 0x2bd   :  { %510 = vsyncpa [#allocation5 + $0x1], 1 }
 0x2be   :  { %511 = vsyncpa [#allocation6], 1 }
 0x2bf   :  { %513 = vsyncpa [#allocation6 + $0x1], 1 }

</bundles_post_ra>
